<compile_context>
chip_gen: v6e
topology: v6e:2x2x1
jax: 0.10.0
libtpu: 0.0.40
codegen_flags: <defaults>
</compile_context>

<pallas_src>
import functools
import math

import jax
import jax.numpy as jnp
from jax.experimental import pallas as pl
from jax.experimental.pallas import tpu as pltpu


def _round_up(x, m):
    return (x + m - 1) // m * m


_FUSE_MAX_NODES = 2048           # adj (bf16) <= 8 MiB -> fully fused path
_PANEL_BYTES = 4 * 1024 * 1024   # target adj row-panel bytes (streaming path)


# ---------------------------------------------------------------------------
# Adjacency (cacheable across forward calls; built directly in bf16).
# ---------------------------------------------------------------------------
def build_adjacency(edge_index, n_pad):
    row, col = edge_index[0], edge_index[1]
    return jnp.zeros((n_pad, n_pad), jnp.bfloat16).at[col, row].add(1.0)


# ---------------------------------------------------------------------------
# Fused single-block kernel (small/medium graphs): adj resident in VMEM,
# everything (fc + relu, propagate chain, eps residual, cla, log_softmax)
# in one pallas_call.
# ---------------------------------------------------------------------------
def _fused_kernel(x_ref, adj_ref, w_re_ref, b_re_ref, w_cla_ref, b_cla_ref,
                  o_ref, *, layer_num, iter_lowpass, eps):
    h = jnp.maximum(
        jnp.dot(x_ref[...], w_re_ref[...], preferred_element_type=jnp.float32)
        + b_re_ref[...], 0.0)
    raw = h
    adj = adj_ref[...]                       # bf16, read once, reused per iter
    for _ in range(layer_num):
        for _ in range(iter_lowpass):
            h = jnp.dot(adj, h.astype(jnp.bfloat16),
                        preferred_element_type=jnp.float32)
        h = h + eps * raw
    logits = (jnp.dot(h, w_cla_ref[...], preferred_element_type=jnp.float32)
              + b_cla_ref[...])
    m = jnp.max(logits, axis=-1, keepdims=True)
    lse = m + jnp.log(jnp.sum(jnp.exp(logits - m), axis=-1, keepdims=True))
    o_ref[...] = logits - lse


def _forward_fused(x_pad, adj, params, w_cla_pad, b_cla_pad, *,
                   layer_num, iter_lowpass, re_eps):
    n_pad = x_pad.shape[0]
    dp = w_cla_pad.shape[1]
    kernel = functools.partial(_fused_kernel, layer_num=layer_num,
                               iter_lowpass=iter_lowpass, eps=re_eps)
    return pl.pallas_call(
        kernel,
        out_shape=jax.ShapeDtypeStruct((n_pad, dp), jnp.float32),
        compiler_params=pltpu.CompilerParams(
            vmem_limit_bytes=32 * 1024 * 1024),
    )(x_pad, adj, params["w_re"], params["b_re"], w_cla_pad, b_cla_pad)


# ---------------------------------------------------------------------------
# Streaming path kernels (adj too large for VMEM residency).
# ---------------------------------------------------------------------------
def _linear_relu_kernel(x_ref, w_ref, b_ref, o_ref):
    y = jnp.dot(x_ref[...], w_ref[...], preferred_element_type=jnp.float32)
    o_ref[...] = jnp.maximum(y + b_ref[...], 0.0)


def _linear_relu(x, w, b, *, tm):
    n, in_dim = x.shape
    d = w.shape[1]
    return pl.pallas_call(
        _linear_relu_kernel,
        grid=(n // tm,),
        out_shape=jax.ShapeDtypeStruct((n, d), jnp.float32),
        in_specs=[
            pl.BlockSpec((tm, in_dim), lambda i: (i, 0)),
            pl.BlockSpec((in_dim, d), lambda i: (0, 0)),
            pl.BlockSpec((1, d), lambda i: (0, 0)),
        ],
        out_specs=pl.BlockSpec((tm, d), lambda i: (i, 0)),
        compiler_params=pltpu.CompilerParams(
            dimension_semantics=("parallel",)),
    )(x, w, b)


# o = adj_rowpanel @ h (+ eps*raw).  adj streams as (tm, N) bf16 row panels
# (double-buffered, ~4 MiB each); h is a constant-index bf16 resident block
# (DMA'd once per call); the single row axis is "parallel" for megacore.
def _prop_res_kernel(adj_ref, h_ref, raw_ref, o_ref, *, eps):
    o_ref[...] = (jnp.dot(adj_ref[...], h_ref[...],
                          preferred_element_type=jnp.float32)
                  + eps * raw_ref[...])


def _prop_kernel(adj_ref, h_ref, o_ref):
    o_ref[...] = jnp.dot(adj_ref[...], h_ref[...],
                         preferred_element_type=jnp.float32)


def _propagate(adj, h_bf16, raw, *, eps, tm, vmem_limit):
    n = adj.shape[0]
    d = h_bf16.shape[1]
    common = dict(
        grid=(n // tm,),
        out_shape=jax.ShapeDtypeStruct((n, d), jnp.float32),
        out_specs=pl.BlockSpec((tm, d), lambda i: (i, 0)),
        compiler_params=pltpu.CompilerParams(
            dimension_semantics=("parallel",),
            vmem_limit_bytes=vmem_limit),
    )
    adj_spec = pl.BlockSpec((tm, n), lambda i: (i, 0))
    h_spec = pl.BlockSpec((n, d), lambda i: (0, 0))
    if raw is None:
        return pl.pallas_call(_prop_kernel, in_specs=[adj_spec, h_spec],
                              **common)(adj, h_bf16)
    kernel = functools.partial(_prop_res_kernel, eps=eps)
    raw_spec = pl.BlockSpec((tm, d), lambda i: (i, 0))
    return pl.pallas_call(kernel, in_specs=[adj_spec, h_spec, raw_spec],
                          **common)(adj, h_bf16, raw)


def _cla_logsoftmax_kernel(h_ref, w_ref, b_ref, o_ref):
    logits = (jnp.dot(h_ref[...], w_ref[...],
                      preferred_element_type=jnp.float32) + b_ref[...])
    m = jnp.max(logits, axis=-1, keepdims=True)
    lse = m + jnp.log(jnp.sum(jnp.exp(logits - m), axis=-1, keepdims=True))
    o_ref[...] = logits - lse


def _cla_logsoftmax(h, w_pad, b_pad, *, tm):
    n, d = h.shape
    dp = w_pad.shape[1]
    return pl.pallas_call(
        _cla_logsoftmax_kernel,
        grid=(n // tm,),
        out_shape=jax.ShapeDtypeStruct((n, dp), jnp.float32),
        in_specs=[
            pl.BlockSpec((tm, d), lambda i: (i, 0)),
            pl.BlockSpec((d, dp), lambda i: (0, 0)),
            pl.BlockSpec((1, dp), lambda i: (0, 0)),
        ],
        out_specs=pl.BlockSpec((tm, dp), lambda i: (i, 0)),
        compiler_params=pltpu.CompilerParams(
            dimension_semantics=("parallel",)),
    )(h, w_pad, b_pad)


def _pick_row_tile(n_pad, elem_bytes=2, panel_budget=_PANEL_BYTES):
    """Largest tm (mult of 8) dividing n_pad with panel <= budget, >=2 tiles."""
    best = 8
    for tm in range(8, n_pad // 2 + 1, 8):
        if n_pad % tm == 0 and tm * n_pad * elem_bytes <= panel_budget:
            best = tm
    return best


# ---------------------------------------------------------------------------
# Full forward (eval mode)
# ---------------------------------------------------------------------------
def esgnn_forward(x, edge_index, params, *, layer_num=2, iter_lowpass=1,
                  re_eps=0.1, ir_eps=0.1, adj=None):
    # TODO(synk): ESGNN_Layer's sub_gate scores, degree norms and the
    # torch.save side effect never influence the returned eval output (the
    # default MessagePassing.message ignores `norm`/`s`), and the ir branch
    # (ir_fc + its propagates, ir_eps) is dead compute in eval mode; both are
    # intentionally omitted.
    del ir_eps

    n = x.shape[0]
    d = params["w_re"].shape[1]
    out_dim = params["w_cla"].shape[1]

    fused = n <= _FUSE_MAX_NODES
    n_pad = _round_up(max(n, 8), 128) if fused else _round_up(n, 256)

    if adj is None:
        adj = build_adjacency(edge_index, n_pad)   # cacheable across calls
    assert adj.shape == (n_pad, n_pad) and adj.dtype == jnp.bfloat16

    x_pad = jnp.zeros((n_pad, x.shape[1]), jnp.float32).at[:n].set(
        x.astype(jnp.float32))

    # lane-dense classifier: pad out_dim to a multiple of 128; padded bias of
    # -1e30 keeps padded columns out of the softmax max / sum-exp.
    dp = _round_up(out_dim, 128)
    w_cla_pad = jnp.zeros((d, dp), jnp.float32).at[:, :out_dim].set(
        params["w_cla"])
    b_cla_pad = jnp.full((1, dp), -1e30, jnp.float32).at[:, :out_dim].set(
        params["b_cla"])

    if fused:
        out_pad = _forward_fused(x_pad, adj, params, w_cla_pad, b_cla_pad,
                                 layer_num=layer_num,
                                 iter_lowpass=iter_lowpass, re_eps=re_eps)
        return out_pad[:n, :out_dim]

    # ---- streaming path -----------------------------------------------------
    tm = _pick_row_tile(n_pad)
    vmem_limit = int(2 * tm * n_pad * 2        # double-buffered adj row panels
                     + 2 * n_pad * d * 2       # resident h (bf16)
                     + 4 * tm * d * 4          # raw / out buffers
                     + 8 * 1024 * 1024)        # headroom

    tlin = 256                                 # n_pad is a multiple of 256
    h = _linear_relu(x_pad, params["w_re"], params["b_re"], tm=tlin)
    raw = h
    for _ in range(layer_num):
        for t in range(iter_lowpass):
            last = t == iter_lowpass - 1
            h = _propagate(adj, h.astype(jnp.bfloat16),
                           raw if last else None,
                           eps=re_eps if last else 0.0,
                           tm=tm, vmem_limit=vmem_limit)
    out_pad = _cla_logsoftmax(h, w_cla_pad, b_cla_pad, tm=tlin)
    return out_pad[:n, :out_dim]


def init_linear(key, fan_in, fan_out):
    """Deterministic nn.Linear-style init; weight stored [fan_in, fan_out]."""
    kw, kb = jax.random.split(key)
    bound = 1.0 / math.sqrt(fan_in)
    w = jax.random.uniform(kw, (fan_in, fan_out), jnp.float32, -bound, bound)
    b = jax.random.uniform(kb, (1, fan_out), jnp.float32, -bound, bound)
    return w, b


if __name__ == "__main__":
    key = jax.random.PRNGKey(0)
    keys = jax.random.split(key, 6)

    N, E = 16, 40
    in_dim, hidden_dim, out_dim = 8, 32, 4
    D = hidden_dim // 2  # width of the re branch

    x = jax.random.normal(keys[0], (N, in_dim), jnp.float32)
    src = jax.random.randint(keys[1], (E,), 0, N, dtype=jnp.int32)
    dst = jax.random.randint(keys[2], (E,), 0, N, dtype=jnp.int32)
    edge_index = jnp.stack([src, dst])  # [2, E], (row, col)

    w_re, b_re = init_linear(keys[3], in_dim, D)
    w_ir, b_ir = init_linear(keys[4], in_dim, D)   # unused in eval mode
    w_cla, b_cla = init_linear(keys[5], D, out_dim)
    params = dict(w_re=w_re, b_re=b_re, w_ir=w_ir, b_ir=b_ir,
                  w_cla=w_cla, b_cla=b_cla)

    out = esgnn_forward(x, edge_index, params,
                        layer_num=2, iter_lowpass=1, re_eps=0.1, ir_eps=0.1)
    jax.block_until_ready(out)
    assert out.shape == (N, out_dim)
    assert bool(jnp.all(jnp.isfinite(out)))
    print("KERNEL_OK")
</pallas_src>

<mosaic_0001>
module attributes {stable_mosaic.version = 11 : i64} {
  func.func @_fused_kernel(%arg0: memref<128x8xf32, #tpu.memory_space<vmem>>, %arg1: memref<128x128xbf16, #tpu.memory_space<vmem>>, %arg2: memref<8x16xf32, #tpu.memory_space<vmem>>, %arg3: memref<1x16xf32, #tpu.memory_space<vmem>>, %arg4: memref<16x128xf32, #tpu.memory_space<vmem>>, %arg5: memref<1x128xf32, #tpu.memory_space<vmem>>, %arg6: memref<128x128xf32, #tpu.memory_space<vmem>>) attributes {dimension_semantics = [], scalar_prefetch = 0 : i64, scratch_operands = 0 : i64, tpu.core_type = #tpu.core_type<tc>} {
    %c0 = arith.constant 0 : index
    %c0_0 = arith.constant 0 : index
    %0 = vector.load %arg0[%c0, %c0_0] : memref<128x8xf32, #tpu.memory_space<vmem>>, vector<128x8xf32>
    %c0_1 = arith.constant 0 : index
    %c0_2 = arith.constant 0 : index
    %1 = vector.load %arg2[%c0_1, %c0_2] : memref<8x16xf32, #tpu.memory_space<vmem>>, vector<8x16xf32>
    %cst = arith.constant dense<0.000000e+00> : vector<128x16xf32>
    %2 = tpu.matmul %0, %1, %cst {dimension_numbers = #tpu.dot_dimension_numbers<[1], [0], [0], [1], [0, 0, 1, 1], [], []>} : vector<128x8xf32>, vector<8x16xf32>, vector<128x16xf32> -> vector<128x16xf32>
    %c0_3 = arith.constant 0 : index
    %c0_4 = arith.constant 0 : index
    %3 = vector.load %arg3[%c0_3, %c0_4] : memref<1x16xf32, #tpu.memory_space<vmem>>, vector<1x16xf32>
    %4 = vector.broadcast %3 : vector<1x16xf32> to vector<128x16xf32>
    %5 = arith.addf %2, %4 : vector<128x16xf32>
    %cst_5 = arith.constant 0.000000e+00 : f32
    %6 = vector.broadcast %cst_5 : f32 to vector<128x16xf32>
    %7 = arith.maximumf %5, %6 : vector<128x16xf32>
    %c0_6 = arith.constant 0 : index
    %c0_7 = arith.constant 0 : index
    %8 = vector.load %arg1[%c0_6, %c0_7] : memref<128x128xbf16, #tpu.memory_space<vmem>>, vector<128x128xbf16>
    %9 = arith.truncf %7 : vector<128x16xf32> to vector<128x16xbf16>
    %cst_8 = arith.constant dense<0.000000e+00> : vector<128x16xf32>
    %10 = tpu.matmul %8, %9, %cst_8 {dimension_numbers = #tpu.dot_dimension_numbers<[1], [0], [0], [1], [0, 0, 1, 1], [], []>} : vector<128x128xbf16>, vector<128x16xbf16>, vector<128x16xf32> -> vector<128x16xf32>
    %cst_9 = arith.constant 1.000000e-01 : f32
    %11 = vector.broadcast %cst_9 : f32 to vector<128x16xf32>
    %12 = arith.mulf %11, %7 : vector<128x16xf32>
    %13 = arith.addf %10, %12 : vector<128x16xf32>
    %14 = arith.truncf %13 : vector<128x16xf32> to vector<128x16xbf16>
    %cst_10 = arith.constant dense<0.000000e+00> : vector<128x16xf32>
    %15 = tpu.matmul %8, %14, %cst_10 {dimension_numbers = #tpu.dot_dimension_numbers<[1], [0], [0], [1], [0, 0, 1, 1], [], []>} : vector<128x128xbf16>, vector<128x16xbf16>, vector<128x16xf32> -> vector<128x16xf32>
    %cst_11 = arith.constant 1.000000e-01 : f32
    %16 = vector.broadcast %cst_11 : f32 to vector<128x16xf32>
    %17 = arith.mulf %16, %7 : vector<128x16xf32>
    %18 = arith.addf %15, %17 : vector<128x16xf32>
    %c0_12 = arith.constant 0 : index
    %c0_13 = arith.constant 0 : index
    %19 = vector.load %arg4[%c0_12, %c0_13] : memref<16x128xf32, #tpu.memory_space<vmem>>, vector<16x128xf32>
    %cst_14 = arith.constant dense<0.000000e+00> : vector<128x128xf32>
    %20 = tpu.matmul %18, %19, %cst_14 {dimension_numbers = #tpu.dot_dimension_numbers<[1], [0], [0], [1], [0, 0, 1, 1], [], []>} : vector<128x16xf32>, vector<16x128xf32>, vector<128x128xf32> -> vector<128x128xf32>
    %c0_15 = arith.constant 0 : index
    %c0_16 = arith.constant 0 : index
    %21 = vector.load %arg5[%c0_15, %c0_16] : memref<1x128xf32, #tpu.memory_space<vmem>>, vector<1x128xf32>
    %22 = vector.broadcast %21 : vector<1x128xf32> to vector<128x128xf32>
    %23 = arith.addf %20, %22 : vector<128x128xf32>
    %cst_17 = arith.constant dense<0xFF800000> : vector<128xf32>
    %24 = vector.multi_reduction <maximumf>, %23, %cst_17 [1] : vector<128x128xf32> to vector<128xf32>
    %25 = vector.shape_cast %24 : vector<128xf32> to vector<128x1xf32>
    %26 = vector.broadcast %25 : vector<128x1xf32> to vector<128x128xf32>
    %27 = arith.subf %23, %26 : vector<128x128xf32>
    %28 = math.exp %27 : vector<128x128xf32>
    %cst_18 = arith.constant dense<0.000000e+00> : vector<128xf32>
    %29 = vector.multi_reduction <add>, %28, %cst_18 [1] : vector<128x128xf32> to vector<128xf32>
    %30 = vector.shape_cast %29 : vector<128xf32> to vector<128x1xf32>
    %31 = math.log %30 : vector<128x1xf32>
    %32 = arith.addf %25, %31 : vector<128x1xf32>
    %33 = vector.broadcast %32 : vector<128x1xf32> to vector<128x128xf32>
    %34 = arith.subf %23, %33 : vector<128x128xf32>
    %c0_19 = arith.constant 0 : index
    %c0_20 = arith.constant 0 : index
    %35 = vector.load %arg6[%c0_19, %c0_20] : memref<128x128xf32, #tpu.memory_space<vmem>>, vector<128x128xf32>
    tpu.vector_store %arg6[%c0_19, %c0_20], %34 {strides = array<i32>} : memref<128x128xf32, #tpu.memory_space<vmem>>, vector<128x128xf32>,
    return
  }
}

</mosaic_0001>

<bundles_post_ra>
// kernel: tpu_custom_call.1
= control target key start
LH: loop header
LB: loop body
LE: loop exit
PB: predicated region body
PF: predicated region fallthrough
CT: control target
= control target key end

     0   :  { %vm49_vm0 = vcmask 64512   ;;  %s1783_s0 = inlined_call_operand.vmem [shape: f32[128,8], index: 0, kind: input, shape index: {}]   ;;  %s1784_s1 = inlined_call_operand.vmem [shape: bf16[128,128], index: 1, kind: input, shape index: {}]   ;;  %s1785_s2 = inlined_call_operand.vmem [shape: f32[8,16], index: 2, kind: input, shape index: {}]   ;;  %s1786_s3 = inlined_call_operand.vmem [shape: f32[1,16], index: 3, kind: input, shape index: {}]   ;;  %s1787_s4 = inlined_call_operand.vmem [shape: f32[16,128], index: 4, kind: input, shape index: {}]   ;;  %s1788_s5 = inlined_call_operand.vmem [shape: f32[1,128], index: 5, kind: input, shape index: {}]   ;;  %s1789_s6 = inlined_call_operand.hbm [shape: f32[128,128], index: 6, kind: output, shape index: {}]  }
   0x1   :  { %v41_v0 = vld [vmem:[%s1785_s2] sm:$0xff]  ;;  %v26_v2 = vld [vmem:[%s1783_s0 + $0x8] sm:$0xff]  ;;  %v27_v3 = vld [vmem:[%s1783_s0 + $0x10] sm:$0xff] }
   0x2   :  { %v25_v1 = vld [vmem:[%s1783_s0] sm:$0xff]  ;;  %1069 = vmatprep.subr.mxu0 %v41_v0  ;;  %v28_v4 = vld [vmem:[%s1783_s0 + $0x18] sm:$0xff]  ;;  %v30_v6 = vld [vmem:[%s1783_s0 + $0x28] sm:$0xff] }
   0x3   :  { %1071 = vmatprep.mubr.msk.f32.mxu0 %vm49_vm0, %v25_v1  ;;  %1070 = vmatpush3.msra.mxu0 %v41_v0  ;;  %v29_v5 = vld [vmem:[%s1783_s0 + $0x20] sm:$0xff]  ;;  %v31_v7 = vld [vmem:[%s1783_s0 + $0x30] sm:$0xff] }
   0x4   :  { %1072 = vmatmul.mubr.msk.f32.vlgmr.msra.gmra.mxu0 %vm49_vm0, %v26_v2 }
   0x5   :  { %1074 = vmatprep.mubr.msk.f32.mxu0 %vm49_vm0, %v27_v3 }
   0x8   :  { %1075 = vmatmul.mubr.msk.f32.gmra.mxu0 %vm49_vm0, %v28_v4 }
   0x9   :  { %1077 = vmatprep.mubr.msk.f32.mxu0 %vm49_vm0, %v29_v5 }
   0xc   :  { %1078 = vmatmul.mubr.msk.f32.gmra.mxu0 %vm49_vm0, %v30_v6 }
   0xd   :  { %11 = vsyncpa [#allocation3], 0  ;;  %1080 = vmatprep.mubr.msk.f32.mxu0 %vm49_vm0, %v31_v7  ;;  %v32_v8 = vld [vmem:[%s1783_s0 + $0x38] sm:$0xff]  ;;  %v33_v9 = vld [vmem:[%s1783_s0 + $0x40] sm:$0xff]  ;;  %vm558_vm1 = vcmask 130048  }
   0xe   :  { %v34_v10 = vld [vmem:[%s1783_s0 + $0x48] sm:$0xff]  ;;  %v35_v11 = vld [vmem:[%s1783_s0 + $0x50] sm:$0xff]  ;;  %v36_v12 = vld [vmem:[%s1783_s0 + $0x58] sm:$0xff] }
   0xf   :  { %v37_v13 = vld [vmem:[%s1783_s0 + $0x60] sm:$0xff]  ;;  %v38_v14 = vld [vmem:[%s1783_s0 + $0x68] sm:$0xff]  ;;  %v39_v15 = vld [vmem:[%s1783_s0 + $0x70] sm:$0xff] }
  0x10   :  { %1081 = vmatmul.mubr.msk.f32.gmra.mxu0 %vm49_vm0, %v32_v8  ;;  %v40_v16 = vld [vmem:[%s1783_s0 + $0x78] sm:$0xff]  ;;  %v1194_v17 = vld [vmem:[%s1784_s1] sm:$0xff]  }
  0x11   :  { %1083 = vmatprep.mubr.msk.f32.mxu0 %vm49_vm0, %v33_v9  ;;  %1111 = vmatprep.mubr.bf16.mxu1 %v1194_v17  ;;  %v960_v32 = vld [vmem:[%s1786_s3] ss:$0 sm:$0xff] }
  0x14   :  { %1084 = vmatmul.mubr.msk.f32.gmra.mxu0 %vm49_vm0, %v34_v10 }
  0x15   :  { %1086 = vmatprep.mubr.msk.f32.mxu0 %vm49_vm0, %v35_v11  ;;  %v1482_v11 = vld [vmem:[%s1784_s1 + $0x8] sm:$0xff]  }
  0x18   :  { %1087 = vmatmul.mubr.msk.f32.gmra.mxu0 %vm49_vm0, %v36_v12  ;;  %v1487_v12 = vld [vmem:[%s1784_s1 + $0x10] sm:$0xff]  }
  0x19   :  { %1089 = vmatprep.mubr.msk.f32.mxu0 %vm49_vm0, %v37_v13  ;;  %v1494_v13 = vld [vmem:[%s1784_s1 + $0x18] sm:$0xff]  }
  0x1c   :  { %1090 = vmatmul.mubr.msk.f32.gmra.mxu0 %vm49_vm0, %v38_v14  ;;  %v1499_v14 = vld [vmem:[%s1784_s1 + $0x20] sm:$0xff]  }
  0x1d   :  { %1092 = vmatprep.mubr.msk.f32.mxu0 %vm49_vm0, %v39_v15  ;;  %v1506_v15 = vld [vmem:[%s1784_s1 + $0x28] sm:$0xff]  }
  0x20   :  { %1093 = vmatmul.mubr.msk.f32.gmra.mxu0 %vm49_vm0, %v40_v16  ;;  %v1511_v16 = vld [vmem:[%s1784_s1 + $0x30] sm:$0xff]  }
  0x21   :  { %1143 = vmatprep.mubr.bf16.mxu0 %v1194_v17  ;;  %v1518_v17 = vld [vmem:[%s1784_s1 + $0x38] sm:$0xff]  }
  0xc4   :  { %v1073_v18 = vpop.f32.mrf.mxu0 }
  0xc5   :  { %v1466_v5 = vadd.f32 %v1073_v18, %v960_v32  ;;  %v1524_v18 = vld [vmem:[%s1787_s4 + $0x8] sm:$0xff] }
  0xc6   :  { %v164_v19 = vpop.f32.mrf.mxu0 }
  0xc7   :  { %v1459_v2 = vadd.f32 %v960_v32, %v164_v19  ;;  %v244_v9 = vmax.f32 %v1466_v5, 0.0  ;;  %v1531_v19 = vld [vmem:[%s1787_s4] sm:$0xff] }
  0xc8   :  { %v1076_v20 = vpop.f32.mrf.mxu0 }
  0xc9   :  { %v1456_v0 = vadd.f32 %v1076_v20, %v960_v32  ;;  %v243_v7 = vmax.f32 %v1459_v2, 0.0 }
  0xca   :  { %v174_v21 = vpop.f32.mrf.mxu0 }
  0xcb   :  { %v1449_v61 = vadd.f32 %v960_v32, %v174_v21  ;;  %v246_v6 = vmax.f32 %v1456_v0, 0.0  ;;  %v275_v10 = vpack.c.bf16 %v244_v9, %v243_v7 }
  0xcc   :  { %v1079_v22 = vpop.f32.mrf.mxu0 }
  0xcd   :  { %v1446_v59 = vadd.f32 %v1079_v22, %v960_v32  ;;  %v245_v3 = vmax.f32 %v1449_v61, 0.0 }
  0xce   :  { %v184_v23 = vpop.f32.mrf.mxu0 }
  0xcf   :  { %v1439_v56 = vadd.f32 %v960_v32, %v184_v23  ;;  %v248_v1 = vmax.f32 %v1446_v59, 0.0  ;;  %v276_v8 = vpack.c.bf16 %v246_v6, %v245_v3 }
  0xd0   :  { %v1082_v24 = vpop.f32.mrf.mxu0 }
  0xd1   :  { %v1436_v54 = vadd.f32 %v1082_v24, %v960_v32  ;;  %v247_v62 = vmax.f32 %v1439_v56, 0.0  ;;  %v283_v56 = vmul.f32 0.1, %v243_v7 }
  0xd2   :  { %v194_v25 = vpop.f32.mrf.mxu0 }
  0xd3   :  { %v1429_v51 = vadd.f32 %v960_v32, %v194_v25  ;;  %v250_v60 = vmax.f32 %v1436_v54, 0.0  ;;  %v277_v4 = vpack.c.bf16 %v248_v1, %v247_v62  ;;  %v287_v54 = vmul.f32 0.1, %v247_v62 }
  0xd4   :  { %v1085_v26 = vpop.f32.mrf.mxu0 }
  0xd5   :  { %v1426_v49 = vadd.f32 %v1085_v26, %v960_v32  ;;  %v249_v57 = vmax.f32 %v1429_v51, 0.0 }
  0xd6   :  { %v204_v27 = vpop.f32.mrf.mxu0 }
  0xd7   :  { %v1419_v46 = vadd.f32 %v960_v32, %v204_v27  ;;  %v252_v55 = vmax.f32 %v1426_v49, 0.0  ;;  %v278_v63 = vpack.c.bf16 %v250_v60, %v249_v57  ;;  %v289_v49 = vmul.f32 0.1, %v249_v57 }
  0xd8   :  { %v1088_v28 = vpop.f32.mrf.mxu0  ;;  %v285_v57 = vmul.f32 0.1, %v245_v3 }
  0xd9   :  { %v1412_v43 = vadd.f32 %v1088_v28, %v960_v32  ;;  %v251_v52 = vmax.f32 %v1419_v46, 0.0 }
  0xda   :  { %v214_v29 = vpop.f32.mrf.mxu0 }
  0xdb   :  { %v1407_v39 = vadd.f32 %v960_v32, %v214_v29  ;;  %v254_v50 = vmax.f32 %v1412_v43, 0.0  ;;  %v279_v58 = vpack.c.bf16 %v252_v55, %v251_v52  ;;  %v1569_v43 = vmul.f32 0.1, %v252_v55 }
  0xdc   :  { %v1091_v30 = vpop.f32.mrf.mxu0 }
  0xdd   :  { %v1403_v37 = vadd.f32 %v1091_v30, %v960_v32  ;;  %v253_v47 = vmax.f32 %v1407_v39, 0.0 }
  0xde   :  { %v224_v31 = vpop.f32.mrf.mxu0 }
  0xdf   :  { %v1399_v34 = vadd.f32 %v960_v32, %v224_v31  ;;  %v256_v44 = vmax.f32 %v1403_v37, 0.0  ;;  %v280_v53 = vpack.c.bf16 %v254_v50, %v253_v47 }
  0xe0   :  { %v1094_v33 = vpop.f32.mrf.mxu0 }
  0xe1   :  { %v1401_v35 = vadd.f32 %v1094_v33, %v960_v32  ;;  %v255_v40 = vmax.f32 %v1399_v34, 0.0  ;;  %v1563_v34 = vmul.f32 0.1, %v253_v47  ;;  %v1578_v47 = vmul.f32 0.1, %v250_v60 }
  0xe2   :  { %v234_v36 = vpop.f32.mrf.mxu0 }
  0xe3   :  { %v1405_v38 = vadd.f32 %v960_v32, %v234_v36  ;;  %v258_v41 = vmax.f32 %v1401_v35, 0.0  ;;  %v281_v48 = vpack.c.bf16 %v256_v44, %v255_v40 }
  0xe5   :  { %v257_v42 = vmax.f32 %v1405_v38, 0.0 }
  0xe7   :  { %v282_v45 = vpack.c.bf16 %v258_v41, %v257_v42  ;;  %v1539_v36 = vmul.f32 0.1, %v257_v42  ;;  %v1557_v42 = vmul.f32 0.1, %v254_v50 }
  0xe9   :  { %1095 = vmatprep.subr.bf16.mxu1 %v282_v45 }
  0xea   :  { %1096 = vmatpush3.bf16.msra.mxu1 %v282_v45  ;;  %v1543_v45 = vmul.f32 0.1, %v258_v41 }
  0xeb   :  { %1097 = vmatprep.subr.bf16.mxu1 %v281_v48 }
  0xee   :  { %1098 = vmatpush3.bf16.msra.mxu1 %v281_v48 }
  0xef   :  { %1099 = vmatprep.subr.bf16.mxu1 %v280_v53 }
  0xf2   :  { %1100 = vmatpush3.bf16.msra.mxu1 %v280_v53 }
  0xf3   :  { %1101 = vmatprep.subr.bf16.mxu1 %v279_v58 }
  0xf6   :  { %1102 = vmatpush3.bf16.msra.mxu1 %v279_v58  ;;  %v1548_v58 = vmul.f32 0.1, %v255_v40 }
  0xf7   :  { %1103 = vmatprep.subr.bf16.mxu1 %v278_v63 }
  0xfa   :  { %1104 = vmatpush3.bf16.msra.mxu1 %v278_v63 }
  0xfb   :  { %1105 = vmatprep.subr.bf16.mxu1 %v277_v4 }
  0xfe   :  { %1106 = vmatpush3.bf16.msra.mxu1 %v277_v4  ;;  %v1553_v4 = vmul.f32 0.1, %v256_v44  ;;  %v1573_v44 = vmul.f32 0.1, %v251_v52  ;;  %v288_v52 = vmul.f32 0.1, %v248_v1 }
  0xff   :  { %1107 = vmatprep.subr.bf16.mxu1 %v276_v8  ;;  %v284_v1 = vmul.f32 0.1, %v244_v9 }
 0x102   :  { %1108 = vmatpush3.bf16.msra.mxu1 %v276_v8 }
 0x103   :  { %1109 = vmatprep.subr.bf16.mxu1 %v275_v10 }
 0x106   :  { %1110 = vmatpush3.bf16.msra.mxu1 %v275_v10 }
 0x107   :  { %1187 = vmatprep.subr.mxu1 %v1524_v18 }
 0x109   :  { %1112 = vmatmul.mubr.bf16.vlgmr.msra.gmra.mxu1 %v1482_v11 }
 0x10a   :  { %1115 = vmatprep.mubr.bf16.mxu1 %v1487_v12  ;;  %1189 = vmatpush3.msra.mxu1 %v1524_v18 }
 0x10b   :  { %1188 = vmatprep.subr.mxu1 %v1531_v19 }
 0x10c   :  { %1190 = vmatpush3.msra.mxu1 %v1531_v19 }
 0x111   :  { %1116 = vmatmul.mubr.bf16.gmra.mxu1 %v1494_v13 }
 0x112   :  { %1119 = vmatprep.mubr.bf16.mxu1 %v1499_v14 }
 0x119   :  { %1120 = vmatmul.mubr.bf16.gmra.mxu1 %v1506_v15 }
 0x11a   :  { %1123 = vmatprep.mubr.bf16.mxu1 %v1511_v16 }
 0x121   :  { %1124 = vmatmul.mubr.bf16.gmra.mxu1 %v1518_v17 }
 0x1c9   :  { %v1113_v20 = vpop.f32.mrf.mxu1 }
 0x1ca   :  { %v390_v59 = vadd.f32 %v1113_v20, %v285_v57 }
 0x1cb   :  { %v1535_v21 = vpop.f32.mrf.mxu1 }
 0x1cc   :  { %v382_v0 = vadd.f32 %v1535_v21, %v283_v56 }
 0x1cd   :  { %v1114_v22 = vpop.f32.mrf.mxu1 }
 0x1cf   :  { %v384_v23 = vpop.f32.mrf.mxu1 }
 0x1d1   :  { %v1117_v24 = vpop.f32.mrf.mxu1 }
 0x1d2   :  { %v406_v46 = vadd.f32 %v1117_v24, %v289_v49 }
 0x1d3   :  { %v397_v25 = vpop.f32.mrf.mxu1 }
 0x1d4   :  { %v398_v51 = vadd.f32 %v397_v25, %v287_v54 }
 0x1d5   :  { %v1118_v26 = vpop.f32.mrf.mxu1 }
 0x1d6   :  { %v409_v55 = vadd.f32 %v1118_v26, %v1578_v47 }
 0x1d7   :  { %v400_v27 = vpop.f32.mrf.mxu1 }
 0x1d8   :  { %v447_v60 = vpack.c.bf16 %v409_v55, %v406_v46 }
 0x1d9   :  { %v1121_v28 = vpop.f32.mrf.mxu1 }
 0x1da   :  { %v422_v37 = vadd.f32 %v1121_v28, %v1563_v34 }
 0x1db   :  { %v413_v29 = vpop.f32.mrf.mxu1 }
 0x1dd   :  { %v1122_v30 = vpop.f32.mrf.mxu1 }
 0x1de   :  { %v425_v40 = vadd.f32 %v1122_v30, %v1557_v42  ;;  %v414_v30 = vadd.f32 %v413_v29, %v1573_v44  ;;  %v286_v29 = vmul.f32 0.1, %v246_v6 }
 0x1df   :  { %v416_v31 = vpop.f32.mrf.mxu1 }
 0x1e0   :  { %v449_v50 = vpack.c.bf16 %v425_v40, %v422_v37  ;;  %v417_v39 = vadd.f32 %v416_v31, %v1569_v43  ;;  %v401_v31 = vadd.f32 %v400_v27, %v288_v52  ;;  %v393_v26 = vadd.f32 %v1114_v22, %v286_v29 }
 0x1e1   :  { %v1125_v32 = vpop.f32.mrf.mxu1  ;;  %v385_v27 = vadd.f32 %v384_v23, %v284_v1 }
 0x1e2   :  { %v438_v53 = vadd.f32 %v1125_v32, %v1539_v36  ;;  %v448_v28 = vpack.c.bf16 %v417_v39, %v414_v30  ;;  %v446_v24 = vpack.c.bf16 %v401_v31, %v398_v51  ;;  %v445_v62 = vpack.c.bf16 %v393_v26, %v390_v59 }
 0x1e3   :  { %v429_v33 = vpop.f32.mrf.mxu1  ;;  %v444_v6 = vpack.c.bf16 %v385_v27, %v382_v0 }
 0x1e4   :  { %v430_v35 = vadd.f32 %v429_v33, %v1548_v58 }
 0x1e5   :  { %v1126_v48 = vpop.f32.mrf.mxu1 }
 0x1e6   :  { %v441_v63 = vadd.f32 %v1126_v48, %v1543_v45 }
 0x1e7   :  { %v432_v38 = vpop.f32.mrf.mxu1 }
 0x1e8   :  { %v451_v41 = vpack.c.bf16 %v441_v63, %v438_v53  ;;  %v433_v8 = vadd.f32 %v432_v38, %v1553_v4 }
 0x1ea   :  { %v450_v10 = vpack.c.bf16 %v433_v8, %v430_v35  ;;  %1127 = vmatprep.subr.bf16.mxu0 %v451_v41 }
 0x1eb   :  { %1128 = vmatpush3.bf16.msra.mxu0 %v451_v41 }
 0x1ec   :  { %1129 = vmatprep.subr.bf16.mxu0 %v450_v10 }
 0x1ef   :  { %1130 = vmatpush3.bf16.msra.mxu0 %v450_v10 }
 0x1f0   :  { %1131 = vmatprep.subr.bf16.mxu0 %v449_v50 }
 0x1f3   :  { %1132 = vmatpush3.bf16.msra.mxu0 %v449_v50 }
 0x1f4   :  { %1133 = vmatprep.subr.bf16.mxu0 %v448_v28 }
 0x1f7   :  { %1134 = vmatpush3.bf16.msra.mxu0 %v448_v28 }
 0x1f8   :  { %1135 = vmatprep.subr.bf16.mxu0 %v447_v60 }
 0x1fb   :  { %1136 = vmatpush3.bf16.msra.mxu0 %v447_v60 }
 0x1fc   :  { %1137 = vmatprep.subr.bf16.mxu0 %v446_v24 }
 0x1ff   :  { %1138 = vmatpush3.bf16.msra.mxu0 %v446_v24 }
 0x200   :  { %1139 = vmatprep.subr.bf16.mxu0 %v445_v62 }
 0x203   :  { %1140 = vmatpush3.bf16.msra.mxu0 %v445_v62 }
 0x204   :  { %1141 = vmatprep.subr.bf16.mxu0 %v444_v6 }
 0x207   :  { %1142 = vmatpush3.bf16.msra.mxu0 %v444_v6 }
 0x208   :  { %1159 = vmatprep.subr.mxu0 %v1524_v18 }
 0x20a   :  { %1144 = vmatmul.mubr.bf16.vlgmr.msra.gmra.mxu0 %v1482_v11 }
 0x20b   :  { %1147 = vmatprep.mubr.bf16.mxu0 %v1487_v12  ;;  %1160 = vmatpush3.msra.mxu0 %v1524_v18 }
 0x20c   :  { %1161 = vmatprep.subr.mxu0 %v1531_v19 }
 0x20d   :  { %1162 = vmatpush3.msra.mxu0 %v1531_v19 }
 0x212   :  { %1148 = vmatmul.mubr.bf16.gmra.mxu0 %v1494_v13 }
 0x213   :  { %1151 = vmatprep.mubr.bf16.mxu0 %v1499_v14 }
 0x21a   :  { %1152 = vmatmul.mubr.bf16.gmra.mxu0 %v1506_v15 }
 0x21b   :  { %1155 = vmatprep.mubr.bf16.mxu0 %v1511_v16 }
 0x222   :  { %1156 = vmatmul.mubr.bf16.gmra.mxu0 %v1518_v17 }
 0x2ca   :  { %v1145_v61 = vpop.f32.mrf.mxu0 }
 0x2cb   :  { %v495_v11 = vadd.f32 %v1145_v61, %v285_v57 }
 0x2cc   :  { %v486_v2 = vpop.f32.mrf.mxu0 }
 0x2cd   :  { %v487_v3 = vadd.f32 %v486_v2, %v283_v56 }
 0x2ce   :  { %v1146_v5 = vpop.f32.mrf.mxu0 }
 0x2cf   :  { %1163 = vmatprep.mubr.msk.f32.mxu0 %vm558_vm1, %v487_v3  ;;  %v498_v15 = vadd.f32 %v1146_v5, %v286_v29 }
 0x2d0   :  { %v489_v7 = vpop.f32.mrf.mxu0 }
 0x2d1   :  { %v490_v9 = vadd.f32 %v489_v7, %v284_v1 }
 0x2d2   :  { %v1149_v12 = vpop.f32.mrf.mxu0 }
 0x2d3   :  { %v511_v13 = vadd.f32 %v1149_v12, %v289_v49  ;;  %1164 = vmatmul.mubr.msk.f32.vlgmr.msra.gmra.mxu0 %vm558_vm1, %v490_v9 }
 0x2d4   :  { %v502_v14 = vpop.f32.mrf.mxu0  ;;  %1166 = vmatprep.mubr.msk.f32.mxu0 %vm558_vm1, %v495_v11 }
 0x2d5   :  { %v503_v16 = vadd.f32 %v502_v14, %v287_v54  ;;  %1172 = vmatprep.mubr.msk.f32.mxu1 %vm558_vm1, %v511_v13 }
 0x2d6   :  { %v1150_v17 = vpop.f32.mrf.mxu0 }
 0x2d7   :  { %v514_v18 = vadd.f32 %v1150_v17, %v1578_v47  ;;  %1167 = vmatmul.mubr.msk.f32.gmra.mxu0 %vm558_vm1, %v498_v15 }
 0x2d8   :  { %v505_v19 = vpop.f32.mrf.mxu0  ;;  %1169 = vmatprep.mubr.msk.f32.mxu0 %vm558_vm1, %v503_v16 }
 0x2d9   :  { %v506_v20 = vadd.f32 %v505_v19, %v288_v52  ;;  %1173 = vmatmul.mubr.msk.f32.vlgmr.msra.gmra.mxu1 %vm558_vm1, %v514_v18 }
 0x2da   :  { %v1153_v21 = vpop.f32.mrf.mxu0 }
 0x2db   :  { %1170 = vmatmul.mubr.msk.f32.gmra.mxu0 %vm558_vm1, %v506_v20  ;;  %v527_v48 = vadd.f32 %v1153_v21, %v1563_v34 }
 0x2dc   :  { %v518_v22 = vpop.f32.mrf.mxu0 }
 0x2dd   :  { %v519_v23 = vadd.f32 %v518_v22, %v1573_v44 }
 0x2de   :  { %v1154_v25 = vpop.f32.mrf.mxu0 }
 0x2df   :  { %1175 = vmatprep.mubr.msk.f32.mxu1 %vm558_vm1, %v519_v23  ;;  %v530_v38 = vadd.f32 %v1154_v25, %v1557_v42 }
 0x2e0   :  { %v521_v32 = vpop.f32.mrf.mxu0 }
 0x2e1   :  { %v522_v33 = vadd.f32 %v521_v32, %v1569_v43 }
 0x2e2   :  { %v1157_v53 = vpop.f32.mrf.mxu0 }
 0x2e3   :  { %1176 = vmatmul.mubr.msk.f32.gmra.mxu1 %vm558_vm1, %v522_v33  ;;  %v543_v34 = vadd.f32 %v1157_v53, %v1539_v36 }
 0x2e4   :  { %v534_v63 = vpop.f32.mrf.mxu0  ;;  %1178 = vmatprep.mubr.msk.f32.mxu1 %vm558_vm1, %v527_v48 }
 0x2e5   :  { %v535_v35 = vadd.f32 %v534_v63, %v1548_v58  ;;  %v985_v58 = vld [vmem:[%s1788_s5] ss:$0 sm:$0xff]  ;;  %s1288_s5 = smov [#allocation2]  }
 0x2e6   :  { %v1158_v41 = vpop.f32.mrf.mxu0  ;;  %s949_s25 = sshll.u32 %s1288_s5, 4  ;;  %s950_s25 = int_to_ptr.vmem [resolvable:$true] %s949_s25 }
 0x2e7   :  { %1179 = vmatmul.mubr.msk.f32.gmra.mxu1 %vm558_vm1, %v530_v38  ;;  %v546_v10 = vadd.f32 %v1158_v41, %v1543_v45  ;;  %s1266_s26 = scalar_lea.vmem %s950_s25, 2048  ;;  %p1271_p1 = scmp.lt.s32.totalorder %s950_s25, %s950_s25 }
 0x2e8   :  { %v537_v8 = vpop.f32.mrf.mxu0  ;;  %1181 = vmatprep.mubr.msk.f32.mxu1 %vm558_vm1, %v535_v35  ;;  %p1267_p0 = scmp.ne.s32.totalorder %s950_s25, %s1266_s26  ;;  %p1272_p2 = scmp.lt.s32.totalorder %s1266_s26, %s1266_s26 }
 0x2e9   :  { %v538_v40 = vadd.f32 %v537_v8, %v1553_v4 }
 0x2ea   :  { %p1273_p3 = por %p1272_p2, %p1271_p1 }
 0x2eb   :  { %1182 = vmatmul.mubr.msk.f32.gmra.mxu1 %vm558_vm1, %v538_v40 }
 0x2ec   :  { %1184 = vmatprep.mubr.msk.f32.mxu1 %vm558_vm1, %v543_v34  ;;  %p1274_p4 = pnand %p1273_p3, %p1267_p0 }
 0x2ef   :  { %1185 = vmatmul.mubr.msk.f32.gmra.mxu1 %vm558_vm1, %v546_v10 }
 0x393   :  { %v1165_v42 = vpop.f32.mrf.mxu0 }
 0x394   :  { %v1636_v37 = vadd.f32 %v1165_v42, %v985_v58 }
 0x395   :  { %v673_v43 = vpop.f32.mrf.mxu0 }
 0x396   :  { %754 = vmax.xlane.f32.xlu0 %v1636_v37  ;;  %v1639_v36 = vadd.f32 %v985_v58, %v673_v43 }
 0x397   :  { %v1168_v4 = vpop.f32.mrf.mxu0 }
 0x398   :  { %v1641_v44 = vadd.f32 %v1168_v4, %v985_v58 }
 0x399   :  { %v683_v50 = vpop.f32.mrf.mxu0  ;;  %v1174_v39 = vpop.f32.mrf.mxu1 }
 0x39a   :  { %758 = vmax.xlane.f32.xlu1 %v1641_v44  ;;  %752 = vmax.xlane.f32.xlu0 %v1639_v36  ;;  %v1645_v30 = vadd.f32 %v985_v58, %v683_v50  ;;  %v1651_v28 = vadd.f32 %v1174_v39, %v985_v58 }
 0x39b   :  { %v1171_v45 = vpop.f32.mrf.mxu0  ;;  %v703_v47 = vpop.f32.mrf.mxu1 }
 0x39c   :  { %v1647_v49 = vadd.f32 %v985_v58, %v703_v47  ;;  %v1657_v54 = vadd.f32 %v1171_v45, %v985_v58 }
 0x39d   :  { %v693_v55 = vpop.f32.mrf.mxu0 }
 0x39e   :  { %756 = vmax.xlane.f32.xlu1 %v1645_v30  ;;  %764 = vmax.xlane.f32.xlu0 %v1647_v49  ;;  %v1653_v46 = vadd.f32 %v985_v58, %v693_v55 }
 0x3a2   :  { %766 = vmax.xlane.f32.xlu1 %v1651_v28  ;;  %760 = vmax.xlane.f32.xlu0 %v1653_v46 }
 0x3a3   :  { %v1177_v52 = vpop.f32.mrf.mxu1 }
 0x3a4   :  { %v1662_v51 = vadd.f32 %v1177_v52, %v985_v58 }
 0x3a5   :  { %v713_v60 = vpop.f32.mrf.mxu1 }
 0x3a6   :  { %v1659_v31 = vadd.f32 %v985_v58, %v713_v60  ;;  %762 = vmax.xlane.f32.xlu1 %v1657_v54 }
 0x3a7   :  { %v1180_v29 = vpop.f32.mrf.mxu1 }
 0x3a8   :  { %768 = vmax.xlane.f32.xlu0 %v1659_v31  ;;  %v1668_v59 = vadd.f32 %v1180_v29, %v985_v58 }
 0x3a9   :  { %v723_v57 = vpop.f32.mrf.mxu1 }
 0x3aa   :  { %v1665_v26 = vadd.f32 %v985_v58, %v723_v57  ;;  %770 = vmax.xlane.f32.xlu1 %v1662_v51 }
 0x3ab   :  { %v1183_v24 = vpop.f32.mrf.mxu1 }
 0x3ac   :  { %772 = vmax.xlane.f32.xlu0 %v1665_v26  ;;  %v1674_v27 = vadd.f32 %v1183_v24, %v985_v58 }
 0x3ad   :  { %v733_v1 = vpop.f32.mrf.mxu1 }
 0x3ae   :  { %v1671_v56 = vadd.f32 %v985_v58, %v733_v1  ;;  %774 = vmax.xlane.f32.xlu1 %v1668_v59 }
 0x3af   :  { %v1186_v62 = vpop.f32.mrf.mxu1 }
 0x3b0   :  { %776 = vmax.xlane.f32.xlu0 %v1671_v56  ;;  %v1680_v61 = vadd.f32 %v1186_v62, %v985_v58 }
 0x3b1   :  { %v743_v0 = vpop.f32.mrf.mxu1 }
 0x3b2   :  { %v1677_v6 = vadd.f32 %v985_v58, %v743_v0  ;;  %778 = vmax.xlane.f32.xlu1 %v1674_v27 }
 0x3b4   :  { %780 = vmax.xlane.f32.xlu0 %v1677_v6 }
 0x3b6   :  { %782 = vmax.xlane.f32.xlu1 %v1680_v61 }
 0x41f   :  { %v1684_v2 = vpop.xlane.xlu0 %754 }
 0x420   :  { %v785_v3 = vsub.f32 %v1636_v37, %v1684_v2 }
 0x422   :  { %v802_v5 = vmul.f32 1.442695, %v785_v3 }
 0x423   :  { %v1688_v7 = vpop.xlane.xlu1 %758  ;;  %v1690_v9 = vpop.xlane.xlu0 %752 }
 0x424   :  { %1202 = vpow2.f32 %v802_v5  ;;  %v787_v11 = vsub.f32 %v1641_v44, %v1688_v7  ;;  %v784_v12 = vsub.f32 %v1639_v36, %v1690_v9 }
 0x426   :  { %v806_v13 = vmul.f32 1.442695, %v787_v11  ;;  %v800_v14 = vmul.f32 1.442695, %v784_v12 }
 0x427   :  { %v1696_v15 = vpop.xlane.xlu1 %756  ;;  %v1698_v16 = vpop.xlane.xlu0 %764 }
 0x428   :  { %1204 = vpow2.f32 %v806_v13  ;;  %v786_v17 = vsub.f32 %v1645_v30, %v1696_v15  ;;  %v790_v18 = vsub.f32 %v1647_v49, %v1698_v16 }
 0x429   :  { %1206 = vpow2.f32 %v800_v14 }
 0x42a   :  { %v804_v19 = vmul.f32 1.442695, %v786_v17  ;;  %v812_v23 = vmul.f32 1.442695, %v790_v18 }
 0x42b   :  { %v1704_v20 = vpop.xlane.xlu1 %766  ;;  %v1706_v21 = vpop.xlane.xlu0 %760 }
 0x42c   :  { %1208 = vpow2.f32 %v804_v19  ;;  %v791_v22 = vsub.f32 %v1651_v28, %v1704_v20  ;;  %v788_v25 = vsub.f32 %v1653_v46, %v1706_v21 }
 0x42e   :  { %v814_v32 = vmul.f32 1.442695, %v791_v22  ;;  %v808_v63 = vmul.f32 1.442695, %v788_v25 }
 0x42f   :  { %v1712_v33 = vpop.xlane.xlu1 %762 }
 0x430   :  { %1210 = vpow2.f32 %v814_v32  ;;  %v789_v48 = vsub.f32 %v1657_v54, %v1712_v33 }
 0x431   :  { %v1203_v53 = vpop.eup %1202  ;;  %1212 = vpow2.f32 %v812_v23  ;;  %v1716_v38 = vpop.xlane.xlu0 %768 }
 0x432   :  { %v810_v35 = vmul.f32 1.442695, %v789_v48  ;;  %v792_v41 = vsub.f32 %v1659_v31, %v1716_v38  ;;  %834 = vadd.xlane.f32.xlu1 %v1203_v53 }
 0x433   :  { %v1720_v8 = vpop.xlane.xlu1 %770 }
 0x434   :  { %1214 = vpow2.f32 %v810_v35  ;;  %v793_v40 = vsub.f32 %v1662_v51, %v1720_v8  ;;  %v816_v10 = vmul.f32 1.442695, %v792_v41 }
 0x435   :  { %v1205_v34 = vpop.eup %1204  ;;  %1216 = vpow2.f32 %v808_v63  ;;  %v1724_v58 = vpop.xlane.xlu0 %772 }
 0x436   :  { %v1207_v42 = vpop.eup %1206  ;;  %v818_v43 = vmul.f32 1.442695, %v793_v40  ;;  %v794_v4 = vsub.f32 %v1665_v26, %v1724_v58  ;;  %838 = vadd.xlane.f32.xlu1 %v1205_v34 }
 0x437   :  { %832 = vadd.xlane.f32.xlu0 %v1207_v42  ;;  %v1728_v50 = vpop.xlane.xlu1 %774 }
 0x438   :  { %1218 = vpow2.f32 %v818_v43  ;;  %v795_v39 = vsub.f32 %v1668_v59, %v1728_v50  ;;  %v820_v47 = vmul.f32 1.442695, %v794_v4 }
 0x439   :  { %v1209_v45 = vpop.eup %1208  ;;  %1220 = vpow2.f32 %v816_v10  ;;  %v1732_v55 = vpop.xlane.xlu0 %776 }
 0x43a   :  { %v822_v52 = vmul.f32 1.442695, %v795_v39  ;;  %v796_v60 = vsub.f32 %v1671_v56, %v1732_v55 }
 0x43b   :  { %836 = vadd.xlane.f32.xlu0 %v1209_v45  ;;  %v1736_v29 = vpop.xlane.xlu1 %778 }
 0x43c   :  { %1222 = vpow2.f32 %v822_v52  ;;  %v797_v57 = vsub.f32 %v1674_v27, %v1736_v29  ;;  %v824_v1 = vmul.f32 1.442695, %v796_v60 }
 0x43d   :  { %v1211_v24 = vpop.eup %1210  ;;  %1224 = vpow2.f32 %v820_v47  ;;  %v1740_v62 = vpop.xlane.xlu0 %780 }
 0x43e   :  { %v1213_v0 = vpop.eup %1212  ;;  %v826_v3 = vmul.f32 1.442695, %v797_v57  ;;  %v798_v5 = vsub.f32 %v1677_v6, %v1740_v62  ;;  %846 = vadd.xlane.f32.xlu1 %v1211_v24 }
 0x43f   :  { %844 = vadd.xlane.f32.xlu0 %v1213_v0  ;;  %v1744_v11 = vpop.xlane.xlu1 %782 }
 0x440   :  { %1226 = vpow2.f32 %v826_v3  ;;  %v799_v12 = vsub.f32 %v1680_v61, %v1744_v11  ;;  %v828_v14 = vmul.f32 1.442695, %v798_v5 }
 0x441   :  { %v1215_v13 = vpop.eup %1214  ;;  %1228 = vpow2.f32 %v824_v1 }
 0x442   :  { %v1217_v17 = vpop.eup %1216  ;;  %v830_v18 = vmul.f32 1.442695, %v799_v12  ;;  %842 = vadd.xlane.f32.xlu1 %v1215_v13 }
 0x443   :  { %840 = vadd.xlane.f32.xlu0 %v1217_v17 }
 0x444   :  { %1230 = vpow2.f32 %v830_v18 }
 0x445   :  { %v1219_v19 = vpop.eup %1218  ;;  %1232 = vpow2.f32 %v828_v14 }
 0x446   :  { %v1221_v22 = vpop.eup %1220  ;;  %850 = vadd.xlane.f32.xlu1 %v1219_v19 }
 0x447   :  { %848 = vadd.xlane.f32.xlu0 %v1221_v22 }
 0x449   :  { %v1223_v23 = vpop.eup %1222 }
 0x44a   :  { %v1225_v25 = vpop.eup %1224  ;;  %854 = vadd.xlane.f32.xlu1 %v1223_v23 }
 0x44b   :  { %852 = vadd.xlane.f32.xlu0 %v1225_v25 }
 0x44d   :  { %v1227_v32 = vpop.eup %1226 }
 0x44e   :  { %v1229_v48 = vpop.eup %1228  ;;  %858 = vadd.xlane.f32.xlu1 %v1227_v32 }
 0x44f   :  { %856 = vadd.xlane.f32.xlu0 %v1229_v48 }
 0x451   :  { %v1231_v53 = vpop.eup %1230 }
 0x452   :  { %v1233_v63 = vpop.eup %1232  ;;  %862 = vadd.xlane.f32.xlu1 %v1231_v53 }
 0x453   :  { %860 = vadd.xlane.f32.xlu0 %v1233_v63 }
 0x4bb   :  { %v835_v35 = vpop.xlane.xlu1 %834 }
 0x4bc   :  { %1234 = vlog2.f32 %v835_v35 }
 0x4bf   :  { %v839_v41 = vpop.xlane.xlu1 %838 }
 0x4c0   :  { %1236 = vlog2.f32 %v839_v41  ;;  %v833_v40 = vpop.xlane.xlu0 %832 }
 0x4c1   :  { %1238 = vlog2.f32 %v833_v40 }
 0x4c4   :  { %v837_v34 = vpop.xlane.xlu0 %836 }
 0x4c5   :  { %1240 = vlog2.f32 %v837_v34 }
 0x4c7   :  { %v847_v10 = vpop.xlane.xlu1 %846 }
 0x4c8   :  { %1242 = vlog2.f32 %v847_v10  ;;  %v845_v42 = vpop.xlane.xlu0 %844 }
 0x4c9   :  { %v1235_v43 = vpop.eup %1234  ;;  %1244 = vlog2.f32 %v845_v42 }
 0x4ca   :  { %v867_v4 = vmul.f32 0.6931472, %v1235_v43 }
 0x4cb   :  { %v843_v39 = vpop.xlane.xlu1 %842 }
 0x4cc   :  { %v897_v45 = vadd.f32 %v867_v4, %v1684_v2  ;;  %1246 = vlog2.f32 %v843_v39  ;;  %v841_v47 = vpop.xlane.xlu0 %840 }
 0x4cd   :  { %v1237_v52 = vpop.eup %1236  ;;  %1248 = vlog2.f32 %v841_v47 }
 0x4ce   :  { %v1239_v60 = vpop.eup %1238  ;;  %v913_v57 = vsub.f32 %v1636_v37, %v897_v45  ;;  %v871_v24 = vmul.f32 0.6931472, %v1237_v52 }
 0x4cf   :  { %v865_v1 = vmul.f32 0.6931472, %v1239_v60  ;;  %v851_v0 = vpop.xlane.xlu1 %850 }
 0x4d0   :  { %929 = vst [vmem:[#allocation2 + $0x8] sm:$0xff] %v913_v57  ;;  %v899_v3 = vadd.f32 %v871_v24, %v1688_v7  ;;  %1250 = vlog2.f32 %v851_v0  ;;  %v849_v5 = vpop.xlane.xlu0 %848 }
 0x4d1   :  { %v896_v12 = vadd.f32 %v865_v1, %v1690_v9  ;;  %1252 = vlog2.f32 %v849_v5 }
 0x4d2   :  { %v1241_v13 = vpop.eup %1240  ;;  %v915_v2 = vsub.f32 %v1641_v44, %v899_v3 }
 0x4d3   :  { %v912_v14 = vsub.f32 %v1639_v36, %v896_v12  ;;  %v869_v17 = vmul.f32 0.6931472, %v1241_v13  ;;  %v855_v18 = vpop.xlane.xlu1 %854 }
 0x4d4   :  { %931 = vst [vmem:[#allocation2 + $0x18] sm:$0xff] %v915_v2  ;;  %1254 = vlog2.f32 %v855_v18  ;;  %v853_v37 = vpop.xlane.xlu0 %852 }
 0x4d5   :  { %v1243_v19 = vpop.eup %1242  ;;  %928 = vst [vmem:[#allocation2] sm:$0xff] %v912_v14  ;;  %v898_v22 = vadd.f32 %v869_v17, %v1696_v15  ;;  %1256 = vlog2.f32 %v853_v37 }
 0x4d6   :  { %v1245_v7 = vpop.eup %1244  ;;  %v879_v23 = vmul.f32 0.6931472, %v1243_v19 }
 0x4d7   :  { %v914_v9 = vsub.f32 %v1645_v30, %v898_v22  ;;  %v877_v25 = vmul.f32 0.6931472, %v1245_v7  ;;  %v859_v32 = vpop.xlane.xlu1 %858 }
 0x4d8   :  { %v903_v44 = vadd.f32 %v879_v23, %v1704_v20  ;;  %1258 = vlog2.f32 %v859_v32  ;;  %v857_v36 = vpop.xlane.xlu0 %856 }
 0x4d9   :  { %v1247_v48 = vpop.eup %1246  ;;  %930 = vst [vmem:[#allocation2 + $0x10] sm:$0xff] %v914_v9  ;;  %v902_v53 = vadd.f32 %v877_v25, %v1698_v16  ;;  %1260 = vlog2.f32 %v857_v36 }
 0x4da   :  { %v1249_v63 = vpop.eup %1248  ;;  %v919_v35 = vsub.f32 %v1651_v28, %v903_v44  ;;  %v875_v15 = vmul.f32 0.6931472, %v1247_v48 }
 0x4db   :  { %v918_v41 = vsub.f32 %v1647_v49, %v902_v53  ;;  %v873_v40 = vmul.f32 0.6931472, %v1249_v63  ;;  %v863_v34 = vpop.xlane.xlu1 %862 }
 0x4dc   :  { %935 = vst [vmem:[#allocation2 + $0x38] sm:$0xff] %v919_v35  ;;  %v901_v30 = vadd.f32 %v875_v15, %v1712_v33  ;;  %1262 = vlog2.f32 %v863_v34  ;;  %v861_v20 = vpop.xlane.xlu0 %860 }
 0x4dd   :  { %v1251_v10 = vpop.eup %1250  ;;  %934 = vst [vmem:[#allocation2 + $0x30] sm:$0xff] %v918_v41  ;;  %v900_v42 = vadd.f32 %v873_v40, %v1706_v21  ;;  %1264 = vlog2.f32 %v861_v20 }
 0x4de   :  { %v1253_v16 = vpop.eup %1252  ;;  %v917_v43 = vsub.f32 %v1657_v54, %v901_v30  ;;  %v883_v4 = vmul.f32 0.6931472, %v1251_v10 }
 0x4df   :  { %v916_v28 = vsub.f32 %v1653_v46, %v900_v42  ;;  %v881_v39 = vmul.f32 0.6931472, %v1253_v16 }
 0x4e0   :  { %933 = vst [vmem:[#allocation2 + $0x28] sm:$0xff] %v917_v43  ;;  %v905_v49 = vadd.f32 %v883_v4, %v1720_v8 }
 0x4e1   :  { %v1255_v45 = vpop.eup %1254  ;;  %932 = vst [vmem:[#allocation2 + $0x20] sm:$0xff] %v916_v28  ;;  %v904_v33 = vadd.f32 %v881_v39, %v1716_v38 }
 0x4e2   :  { %v1257_v47 = vpop.eup %1256  ;;  %v921_v52 = vsub.f32 %v1662_v51, %v905_v49  ;;  %v887_v60 = vmul.f32 0.6931472, %v1255_v45 }
 0x4e3   :  { %v920_v21 = vsub.f32 %v1659_v31, %v904_v33  ;;  %v885_v57 = vmul.f32 0.6931472, %v1257_v47 }
 0x4e4   :  { %937 = vst [vmem:[#allocation2 + $0x48] sm:$0xff] %v921_v52  ;;  %v907_v54 = vadd.f32 %v887_v60, %v1728_v50 }
 0x4e5   :  { %v1259_v24 = vpop.eup %1258  ;;  %936 = vst [vmem:[#allocation2 + $0x40] sm:$0xff] %v920_v21  ;;  %v906_v46 = vadd.f32 %v885_v57, %v1724_v58 }
 0x4e6   :  { %v1261_v1 = vpop.eup %1260  ;;  %v923_v8 = vsub.f32 %v1668_v59, %v907_v54  ;;  %v891_v0 = vmul.f32 0.6931472, %v1259_v24 }
 0x4e7   :  { %v922_v38 = vsub.f32 %v1665_v26, %v906_v46  ;;  %v889_v3 = vmul.f32 0.6931472, %v1261_v1 }
 0x4e8   :  { %939 = vst [vmem:[#allocation2 + $0x58] sm:$0xff] %v923_v8  ;;  %v909_v51 = vadd.f32 %v891_v0, %v1736_v29 }
 0x4e9   :  { %v1263_v5 = vpop.eup %1262  ;;  %938 = vst [vmem:[#allocation2 + $0x50] sm:$0xff] %v922_v38  ;;  %v908_v31 = vadd.f32 %v889_v3, %v1732_v55 }
 0x4ea   :  { %v1265_v12 = vpop.eup %1264  ;;  %v925_v50 = vsub.f32 %v1674_v27, %v909_v51  ;;  %v895_v13 = vmul.f32 0.6931472, %v1263_v5 }
 0x4eb   :  { %v924_v58 = vsub.f32 %v1671_v56, %v908_v31  ;;  %v893_v2 = vmul.f32 0.6931472, %v1265_v12 }
 0x4ec   :  { %941 = vst [vmem:[#allocation2 + $0x68] sm:$0xff] %v925_v50  ;;  %v911_v26 = vadd.f32 %v895_v13, %v1744_v11 }
 0x4ed   :  { %940 = vst [vmem:[#allocation2 + $0x60] sm:$0xff] %v924_v58  ;;  %v910_v59 = vadd.f32 %v893_v2, %v1740_v62 }
 0x4ee   :  { %v927_v29 = vsub.f32 %v1680_v61, %v911_v26 }
 0x4ef   :  { %v926_v55 = vsub.f32 %v1677_v6, %v910_v59 }
 0x4f0   :  { %943 = vst [vmem:[#allocation2 + $0x78] sm:$0xff] %v927_v29 }
 0x4f1   :  { %942 = vst [vmem:[#allocation2 + $0x70] sm:$0xff] %v926_v55 }
 0x4f2   :  { %1277 = shalt.err (!%p1274_p4)
}
 0x4f3   :  { %s1289_s27 = smov 128   ;;  %s1290_s28 = smov 8  }
 0x4f4   :  { %955 = dma.vmem_to_hbm [thread:$0]  %s950_s25, 2048, %s1789_s6, [#allocation3], %s1289_s27, %s1289_s27, %s1290_s28  }
 0x4f5   :  { %1286 = dma.done.wait [#allocation3], 2048  }
 0x4f6   :  { %1287 = vsyncadd [#allocation3], 4294965248 }
 0x4f7   :  { %959 = vsyncpa [#allocation3], 1 }

</bundles_post_ra>
